<compile_context>
chip_gen: v7x
topology: tpu7x:2x2x1
jax: 0.10.0
libtpu: 0.0.40
codegen_flags: <defaults>
</compile_context>

<pallas_src>
import jax
import jax.numpy as jnp
import numpy as np
from jax.experimental import pallas as pl
from jax.experimental.pallas import tpu as pltpu


# ---------------------------------------------------------------------------
# Pallas kernels:  out^T = PReLU(W^T @ patches^T + bias) [+ residual]
# ---------------------------------------------------------------------------
def _gemm_bias_prelu_kernel(a_ref, b_ref, bias_ref, alpha_ref, o_ref):
    acc = jnp.dot(a_ref[...], b_ref[0], preferred_element_type=jnp.float32)
    acc = acc + bias_ref[...]                      # (r_pad, tn) + (r_pad, 1)
    alpha = alpha_ref[0]                           # scalar PReLU slope (SMEM)
    o_ref[0] = jnp.where(acc >= 0.0, acc, alpha * acc).astype(o_ref.dtype)


def _gemm_bias_prelu_res_kernel(a_ref, b_ref, bias_ref, alpha_ref, r_ref, o_ref):
    acc = jnp.dot(a_ref[...], b_ref[0], preferred_element_type=jnp.float32)
    acc = acc + bias_ref[...]
    alpha = alpha_ref[0]
    y = jnp.where(acc >= 0.0, acc, alpha * acc)
    o_ref[0] = (y + r_ref[0].astype(jnp.float32)).astype(o_ref.dtype)


# ---------------------------------------------------------------------------
# GEMM wrapper: padding, VMEM-aware lane tiling, bf16 cast, pallas_call
# ---------------------------------------------------------------------------
def _round_up(v, m):
    return (v + m - 1) // m * m


def _vmem_cap_bytes():
    try:
        return int(pltpu.get_tpu_info().vmem_capacity_bytes)
    except Exception:
        return 64 * 2**20          # conservative default (v7x per-TC VMEM)


def _gemm_transposed(a_t, b_t, bias, alpha, residual=None,
                     out_dtype=jnp.bfloat16):
    """out[n] = PReLU(a_t @ b_t[n] + bias) (+ residual[n]).

    a_t: (R, K) weight^T,  b_t: (N, K, M) patches^T.
    Returns the *padded* transposed output (N, r_pad, Mp); callers slice the
    real (R, M) region only when a standard spatial layout is needed.
    """
    r, k_dim = a_t.shape
    nb, k2, m = b_t.shape
    assert k_dim == k2, (a_t.shape, b_t.shape)
    r_pad = _round_up(r, 16)
    out_isz = np.dtype(out_dtype).itemsize

    # Lane (M) tile: one step if it fits, otherwise the largest 128-multiple
    # allowed by a VMEM-derived budget (no forced multi-step grid).
    vmem_cap = _vmem_cap_bytes()
    budget = max(vmem_cap // 4, 8 * 2**20)
    fixed = r_pad * k_dim * 2 + r_pad * 4                         # A + bias
    per_tn = (2 * k_dim * 2 + 2 * r_pad * out_isz
              + (2 * r_pad * 2 if residual is not None else 0))   # dbl-buffered
    tn_budget = max((budget - fixed) // per_tn, 128)
    tn_budget = (tn_budget // 128) * 128
    tn = int(min(_round_up(m, 128), tn_budget, 4096))
    mp = _round_up(m, tn)

    a = jnp.pad(a_t.astype(jnp.bfloat16), ((0, r_pad - r), (0, 0)))
    b = jnp.pad(b_t.astype(jnp.bfloat16), ((0, 0), (0, 0), (0, mp - m)))
    bias_col = jnp.pad(bias.astype(jnp.float32).reshape(r, 1),
                       ((0, r_pad - r), (0, 0)))
    alpha_arr = jnp.reshape(alpha, (1,)).astype(jnp.float32)

    in_specs = [
        pl.BlockSpec((r_pad, k_dim), lambda n, j: (0, 0)),        # W^T (resident)
        pl.BlockSpec((1, k_dim, tn), lambda n, j: (n, 0, j)),     # patches^T tile
        pl.BlockSpec((r_pad, 1), lambda n, j: (0, 0)),            # bias column
        pl.BlockSpec(memory_space=pltpu.MemorySpace.SMEM),        # PReLU alpha
    ]
    inputs = [a, b, bias_col, alpha_arr]
    kernel = _gemm_bias_prelu_kernel
    res_bytes = 0
    if residual is not None:
        res = residual
        if res.shape != (nb, r_pad, mp):
            res = res[:, :min(res.shape[1], r_pad), :min(res.shape[2], mp)]
            res = jnp.pad(res, ((0, 0), (0, r_pad - res.shape[1]),
                                (0, mp - res.shape[2])))
        in_specs.append(pl.BlockSpec((1, r_pad, tn), lambda n, j: (n, 0, j)))
        inputs.append(res.astype(jnp.bfloat16))
        kernel = _gemm_bias_prelu_res_kernel
        res_bytes = nb * r_pad * mp * 2

    step_bytes = fixed + per_tn * tn
    vmem_limit = int(min(max(2 * step_bytes + (4 << 20), 8 << 20),
                         int(vmem_cap * 0.9)))
    flops = 2 * nb * r_pad * k_dim * mp
    bytes_accessed = (r_pad * k_dim * 2 + nb * k_dim * mp * 2 + r_pad * 4 + 4
                      + nb * r_pad * mp * out_isz + res_bytes)

    return pl.pallas_call(
        kernel,
        out_shape=jax.ShapeDtypeStruct((nb, r_pad, mp), out_dtype),
        grid_spec=pltpu.PrefetchScalarGridSpec(
            num_scalar_prefetch=0,
            grid=(nb, mp // tn),
            in_specs=in_specs,
            out_specs=pl.BlockSpec((1, r_pad, tn), lambda n, j: (n, 0, j)),
        ),
        compiler_params=pltpu.CompilerParams(
            dimension_semantics=("parallel", "parallel"),
            vmem_limit_bytes=vmem_limit),
        cost_estimate=pl.CostEstimate(
            flops=flops, transcendentals=0, bytes_accessed=bytes_accessed),
    )(*inputs)


# ---------------------------------------------------------------------------
# XLA glue: patch extraction (no gathers), conv / sub-pixel deconv wrappers
# ---------------------------------------------------------------------------
def _conv_patches_nchw(x, k, s, p):
    """(N, C, H, W) -> patches^T (N, C*k*k, Ho*Wo); feature order (c, kh, kw)."""
    pat = jax.lax.conv_general_dilated_patches(
        x, filter_shape=(k, k), window_strides=(s, s),
        padding=[(p, p), (p, p)],
        dimension_numbers=('NCHW', 'OIHW', 'NCHW'))
    n, kk, ho, wo = pat.shape
    return pat.reshape(n, kk, ho * wo), (ho, wo)


def _to_nchw(out_t, cout, ho, wo):
    n = out_t.shape[0]
    return out_t[:, :cout, :ho * wo].reshape(n, cout, ho, wo)


def conv_block(x_nchw, w_oihw, b, alpha, k, s, p, residual=None,
               out_dtype=jnp.bfloat16):
    cout = w_oihw.shape[0]
    patches, (ho, wo) = _conv_patches_nchw(x_nchw, k, s, p)
    a_t = w_oihw.reshape(cout, -1)          # rows = cout, cols = (cin, kh, kw)
    out_t = _gemm_transposed(a_t, patches, b, alpha,
                             residual=residual, out_dtype=out_dtype)
    return out_t, (cout, ho, wo)


def deconv_block(x_nchw, w_iohw, b, alpha, k, s, p, out_dtype=jnp.bfloat16):
    """ConvTranspose2d via sub-pixel (s*s phase) decomposition (one small GEMM)."""
    assert p >= 0 and s >= 1 and k >= 1
    n, cin, h, w = x_nchw.shape
    cout = w_iohw.shape[1]
    T = -(-k // s)
    wp = jnp.pad(w_iohw, ((0, 0), (0, 0), (0, T * s - k), (0, T * s - k)))
    wr = wp.reshape(cin, cout, T, s, T, s)        # [ci, co, dt_h, ph_h, dt_w, ph_w]
    wr = jnp.flip(wr, axis=(2, 4))                # dt -> th = T-1-dt
    w_eq = wr.transpose(0, 2, 4, 3, 5, 1).reshape(cin * T * T, s * s * cout)
    a_t = w_eq.T                                  # rows = (ph_h, ph_w, co)
    b_eq = jnp.tile(b, s * s)                     # bias per (phase, cout) row

    patches, (bh, bw) = _conv_patches_nchw(x_nchw, T, 1, T - 1)   # (ci, th, tw)
    out_t = _gemm_transposed(a_t, patches, b_eq, alpha, out_dtype=out_dtype)

    rows = s * s * cout
    grid_full = out_t[:, :rows, :bh * bw].reshape(n, s, s, cout, bh, bw)
    grid_full = grid_full.transpose(0, 3, 4, 1, 5, 2).reshape(
        n, cout, bh * s, bw * s)
    h_out = (h - 1) * s - 2 * p + k
    w_out = (w - 1) * s - 2 * p + k
    return grid_full[:, :, p:p + h_out, p:p + w_out]


def down_block(x, params, k=8, s=4, p=2):
    xb = x.astype(jnp.bfloat16)
    # l0 = PReLU(conv1(x)) — kept in padded transposed layout (N, 16, Mp), bf16.
    l0_t, (c1, h1, w1) = conv_block(xb, params['w1'], params['b1'],
                                    params['a1'], k, s, p)
    l0_std = _to_nchw(l0_t, c1, h1, w1)               # (N, C, h1, w1) bf16
    # h0 = PReLU(deconv(l0))
    h0 = deconv_block(l0_std, params['w2'], params['b2'], params['a2'], k, s, p)
    # TODO(synk): the phase de-interleave and 'h0 - x' stay in XLA; fusing them
    # needs an out_spec phase scatter plus a phase-shuffled copy of x.
    d = (h0 - xb).astype(jnp.bfloat16)
    # l1 = PReLU(conv3(h0 - x)); 'l1 + l0' fused in-kernel, reusing the padded
    # transposed l0 directly (no slice / re-pad between stages).
    out_t, (c3, h3, w3) = conv_block(d, params['w3'], params['b3'],
                                     params['a3'], k, s, p,
                                     residual=l0_t, out_dtype=jnp.float32)
    return _to_nchw(out_t, c3, h3, w3)


# ---------------------------------------------------------------------------
# Pure-JAX reference (lax convs) mirroring the same bf16 quantization points.
# ---------------------------------------------------------------------------
def _prelu(v, a):
    return jnp.where(v >= 0, v, a * v)


def _ref_conv(x_bf16, w, b, alpha, s, p, lhs_dilation=(1, 1)):
    y = jax.lax.conv_general_dilated(
        x_bf16, w.astype(jnp.bfloat16), window_strides=(s, s),
        padding=[(p, p), (p, p)], lhs_dilation=lhs_dilation,
        dimension_numbers=('NCHW', 'OIHW', 'NCHW'),
        preferred_element_type=jnp.float32)
    return _prelu(y + b[None, :, None, None], alpha)


def down_block_ref(x, params, k=8, s=4, p=2):
    xb = x.astype(jnp.bfloat16)
    l0 = _ref_conv(xb, params['w1'], params['b1'], params['a1'],
                   s, p).astype(jnp.bfloat16)
    w2_eq = jnp.flip(params['w2'], axis=(2, 3)).transpose(1, 0, 2, 3)
    h0 = _ref_conv(l0, w2_eq, params['b2'], params['a2'], 1, k - 1 - p,
                   lhs_dilation=(s, s)).astype(jnp.bfloat16)
    d = (h0 - xb).astype(jnp.bfloat16)
    l1 = _ref_conv(d, params['w3'], params['b3'], params['a3'], s, p)
    return l1 + l0.astype(jnp.float32)


# ---------------------------------------------------------------------------
if __name__ == "__main__":
    key = jax.random.PRNGKey(0)
    C, K_, S_, P_ = 4, 8, 4, 2
    k1, k2, k3, k4, k5, k6, kx = jax.random.split(key, 7)
    scale = 0.05
    params = {
        'w1': jax.random.normal(k1, (C, C, K_, K_), jnp.float32) * scale,  # Conv2d OIHW
        'b1': jax.random.normal(k2, (C,), jnp.float32) * scale,
        'a1': jnp.float32(0.25),                                           # PReLU init
        'w2': jax.random.normal(k3, (C, C, K_, K_), jnp.float32) * scale,  # ConvTranspose2d (in,out,kh,kw)
        'b2': jax.random.normal(k4, (C,), jnp.float32) * scale,
        'a2': jnp.float32(0.25),
        'w3': jax.random.normal(k5, (C, C, K_, K_), jnp.float32) * scale,
        'b3': jax.random.normal(k6, (C,), jnp.float32) * scale,
        'a3': jnp.float32(0.25),
    }
    x = jax.random.normal(kx, (2, C, 16, 16), jnp.float32)

    out = jax.jit(down_block)(x, params)
    out = jax.block_until_ready(out)

    ref = down_block_ref(x, params)
    assert out.shape == (2, C, 4, 4), out.shape
    max_err = float(jnp.max(jnp.abs(out - ref)))
    assert max_err < 2e-3, max_err
    print("KERNEL_OK")
</pallas_src>

<mosaic_0001>
module attributes {stable_mosaic.version = 11 : i64} {
  func.func @_gemm_bias_prelu_kernel(%arg0: i32, %arg1: i32, %arg2: memref<16x256xbf16, #tpu.memory_space<vmem>>, %arg3: memref<1x256x128xbf16, #tpu.memory_space<vmem>>, %arg4: memref<16x1xf32, #tpu.memory_space<vmem>>, %arg5: memref<1xf32, #tpu.memory_space<smem>>, %arg6: memref<1x16x128xbf16, #tpu.memory_space<vmem>>) attributes {dimension_semantics = [#tpu.dimension_semantics<parallel>, #tpu.dimension_semantics<parallel>], iteration_bounds = array<i64: 2, 1>, scalar_prefetch = 0 : i64, scratch_operands = 0 : i64, tpu.core_type = #tpu.core_type<tc>, window_params = [{pipeline_mode = #tpu.pipeline_mode<synchronous>, transform_indices = @transform_0, window_bounds = array<i64: 16, 256>}, {transform_indices = @transform_1, window_bounds = array<i64: 1, 256, 128>}, {pipeline_mode = #tpu.pipeline_mode<synchronous>, transform_indices = @transform_2, window_bounds = array<i64: 16, 1>}, {transform_indices = @transform_3, window_bounds = array<i64: 1>}, {transform_indices = @transform_4, window_bounds = array<i64: 1, 16, 128>}]} {
    %c0 = arith.constant 0 : index
    %c0_0 = arith.constant 0 : index
    %0 = vector.load %arg2[%c0, %c0_0] : memref<16x256xbf16, #tpu.memory_space<vmem>>, vector<16x256xbf16>
    %c0_1 = arith.constant 0 : index
    %c0_2 = arith.constant 0 : index
    %c0_3 = arith.constant 0 : index
    %1 = vector.load %arg3[%c0_1, %c0_2, %c0_3] : memref<1x256x128xbf16, #tpu.memory_space<vmem>>, vector<1x256x128xbf16>
    %2 = vector.shape_cast %1 : vector<1x256x128xbf16> to vector<256x128xbf16>
    %cst = arith.constant dense<0.000000e+00> : vector<16x128xf32>
    %3 = tpu.matmul %0, %2, %cst {dimension_numbers = #tpu.dot_dimension_numbers<[1], [0], [0], [1], [0, 0, 1, 1], [], []>} : vector<16x256xbf16>, vector<256x128xbf16>, vector<16x128xf32> -> vector<16x128xf32>
    %c0_4 = arith.constant 0 : index
    %c0_5 = arith.constant 0 : index
    %4 = vector.load %arg4[%c0_4, %c0_5] : memref<16x1xf32, #tpu.memory_space<vmem>>, vector<16x1xf32>
    %5 = vector.broadcast %4 : vector<16x1xf32> to vector<16x128xf32>
    %6 = arith.addf %3, %5 : vector<16x128xf32>
    %c0_6 = arith.constant 0 : index
    %7 = memref.load %arg5[%c0_6] : memref<1xf32, #tpu.memory_space<smem>>
    %cst_7 = arith.constant 0.000000e+00 : f32
    %8 = vector.broadcast %cst_7 : f32 to vector<16x128xf32>
    %9 = arith.cmpf oge, %6, %8 : vector<16x128xf32>
    %10 = vector.broadcast %7 : f32 to vector<16x128xf32>
    %11 = arith.mulf %10, %6 : vector<16x128xf32>
    %12 = arith.select %9, %6, %11 : vector<16x128xi1>, vector<16x128xf32>
    %13 = arith.truncf %12 : vector<16x128xf32> to vector<16x128xbf16>
    %c0_8 = arith.constant 0 : index
    %c0_9 = arith.constant 0 : index
    %c0_10 = arith.constant 0 : index
    %14 = vector.load %arg6[%c0_8, %c0_9, %c0_10] : memref<1x16x128xbf16, #tpu.memory_space<vmem>>, vector<1x16x128xbf16>
    %15 = vector.shape_cast %14 : vector<1x16x128xbf16> to vector<16x128xbf16>
    %16 = vector.shape_cast %13 : vector<16x128xbf16> to vector<1x16x128xbf16>
    tpu.vector_store %arg6[%c0_8, %c0_9, %c0_10], %16 {strides = array<i32>} : memref<1x16x128xbf16, #tpu.memory_space<vmem>>, vector<1x16x128xbf16>,
    return
  }
  func.func @transform_0(%arg0: i32, %arg1: i32) -> (i32, i32) {
    %c0_i32 = arith.constant 0 : i32
    %c0_i32_0 = arith.constant 0 : i32
    %c0_i32_1 = arith.constant 0 : i32
    return %c0_i32, %c0_i32_0 : i32, i32
  }
  func.func @transform_1(%arg0: i32, %arg1: i32) -> (i32, i32, i32) {
    %c0_i32 = arith.constant 0 : i32
    %c0_i32_0 = arith.constant 0 : i32
    return %arg0, %c0_i32, %arg1 : i32, i32, i32
  }
  func.func @transform_2(%arg0: i32, %arg1: i32) -> (i32, i32) {
    %c0_i32 = arith.constant 0 : i32
    %c0_i32_0 = arith.constant 0 : i32
    %c0_i32_1 = arith.constant 0 : i32
    return %c0_i32, %c0_i32_0 : i32, i32
  }
  func.func @transform_3(%arg0: i32, %arg1: i32) -> i32 {
    %c0_i32 = arith.constant 0 : i32
    %c0_i32_0 = arith.constant 0 : i32
    return %c0_i32 : i32
  }
  func.func @transform_4(%arg0: i32, %arg1: i32) -> (i32, i32, i32) {
    %c0_i32 = arith.constant 0 : i32
    %c0_i32_0 = arith.constant 0 : i32
    return %arg0, %c0_i32, %arg1 : i32, i32, i32
  }
}

module attributes {stable_mosaic.version = 11 : i64} {
  func.func @_gemm_bias_prelu_kernel(%arg0: i32, %arg1: i32, %arg2: memref<64x16xbf16, #tpu.memory_space<vmem>>, %arg3: memref<1x16x128xbf16, #tpu.memory_space<vmem>>, %arg4: memref<64x1xf32, #tpu.memory_space<vmem>>, %arg5: memref<1xf32, #tpu.memory_space<smem>>, %arg6: memref<1x64x128xbf16, #tpu.memory_space<vmem>>) attributes {dimension_semantics = [#tpu.dimension_semantics<parallel>, #tpu.dimension_semantics<parallel>], iteration_bounds = array<i64: 2, 1>, scalar_prefetch = 0 : i64, scratch_operands = 0 : i64, tpu.core_type = #tpu.core_type<tc>, window_params = [{pipeline_mode = #tpu.pipeline_mode<synchronous>, transform_indices = @transform_0, window_bounds = array<i64: 64, 16>}, {transform_indices = @transform_1, window_bounds = array<i64: 1, 16, 128>}, {pipeline_mode = #tpu.pipeline_mode<synchronous>, transform_indices = @transform_2, window_bounds = array<i64: 64, 1>}, {transform_indices = @transform_3, window_bounds = array<i64: 1>}, {transform_indices = @transform_4, window_bounds = array<i64: 1, 64, 128>}]} {
    %c0 = arith.constant 0 : index
    %c0_0 = arith.constant 0 : index
    %0 = vector.load %arg2[%c0, %c0_0] : memref<64x16xbf16, #tpu.memory_space<vmem>>, vector<64x16xbf16>
    %c0_1 = arith.constant 0 : index
    %c0_2 = arith.constant 0 : index
    %c0_3 = arith.constant 0 : index
    %1 = vector.load %arg3[%c0_1, %c0_2, %c0_3] : memref<1x16x128xbf16, #tpu.memory_space<vmem>>, vector<1x16x128xbf16>
    %2 = vector.shape_cast %1 : vector<1x16x128xbf16> to vector<16x128xbf16>
    %cst = arith.constant dense<0.000000e+00> : vector<64x128xf32>
    %3 = tpu.matmul %0, %2, %cst {dimension_numbers = #tpu.dot_dimension_numbers<[1], [0], [0], [1], [0, 0, 1, 1], [], []>} : vector<64x16xbf16>, vector<16x128xbf16>, vector<64x128xf32> -> vector<64x128xf32>
    %c0_4 = arith.constant 0 : index
    %c0_5 = arith.constant 0 : index
    %4 = vector.load %arg4[%c0_4, %c0_5] : memref<64x1xf32, #tpu.memory_space<vmem>>, vector<64x1xf32>
    %5 = vector.broadcast %4 : vector<64x1xf32> to vector<64x128xf32>
    %6 = arith.addf %3, %5 : vector<64x128xf32>
    %c0_6 = arith.constant 0 : index
    %7 = memref.load %arg5[%c0_6] : memref<1xf32, #tpu.memory_space<smem>>
    %cst_7 = arith.constant 0.000000e+00 : f32
    %8 = vector.broadcast %cst_7 : f32 to vector<64x128xf32>
    %9 = arith.cmpf oge, %6, %8 : vector<64x128xf32>
    %10 = vector.broadcast %7 : f32 to vector<64x128xf32>
    %11 = arith.mulf %10, %6 : vector<64x128xf32>
    %12 = arith.select %9, %6, %11 : vector<64x128xi1>, vector<64x128xf32>
    %13 = arith.truncf %12 : vector<64x128xf32> to vector<64x128xbf16>
    %c0_8 = arith.constant 0 : index
    %c0_9 = arith.constant 0 : index
    %c0_10 = arith.constant 0 : index
    %14 = vector.load %arg6[%c0_8, %c0_9, %c0_10] : memref<1x64x128xbf16, #tpu.memory_space<vmem>>, vector<1x64x128xbf16>
    %15 = vector.shape_cast %14 : vector<1x64x128xbf16> to vector<64x128xbf16>
    %16 = vector.shape_cast %13 : vector<64x128xbf16> to vector<1x64x128xbf16>
    tpu.vector_store %arg6[%c0_8, %c0_9, %c0_10], %16 {strides = array<i32>} : memref<1x64x128xbf16, #tpu.memory_space<vmem>>, vector<1x64x128xbf16>,
    return
  }
  func.func @transform_0(%arg0: i32, %arg1: i32) -> (i32, i32) {
    %c0_i32 = arith.constant 0 : i32
    %c0_i32_0 = arith.constant 0 : i32
    %c0_i32_1 = arith.constant 0 : i32
    return %c0_i32, %c0_i32_0 : i32, i32
  }
  func.func @transform_1(%arg0: i32, %arg1: i32) -> (i32, i32, i32) {
    %c0_i32 = arith.constant 0 : i32
    %c0_i32_0 = arith.constant 0 : i32
    return %arg0, %c0_i32, %arg1 : i32, i32, i32
  }
  func.func @transform_2(%arg0: i32, %arg1: i32) -> (i32, i32) {
    %c0_i32 = arith.constant 0 : i32
    %c0_i32_0 = arith.constant 0 : i32
    %c0_i32_1 = arith.constant 0 : i32
    return %c0_i32, %c0_i32_0 : i32, i32
  }
  func.func @transform_3(%arg0: i32, %arg1: i32) -> i32 {
    %c0_i32 = arith.constant 0 : i32
    %c0_i32_0 = arith.constant 0 : i32
    return %c0_i32 : i32
  }
  func.func @transform_4(%arg0: i32, %arg1: i32) -> (i32, i32, i32) {
    %c0_i32 = arith.constant 0 : i32
    %c0_i32_0 = arith.constant 0 : i32
    return %arg0, %c0_i32, %arg1 : i32, i32, i32
  }
}

module attributes {stable_mosaic.version = 11 : i64} {
  func.func @_gemm_bias_prelu_res_kernel(%arg0: i32, %arg1: i32, %arg2: memref<16x256xbf16, #tpu.memory_space<vmem>>, %arg3: memref<1x256x128xbf16, #tpu.memory_space<vmem>>, %arg4: memref<16x1xf32, #tpu.memory_space<vmem>>, %arg5: memref<1xf32, #tpu.memory_space<smem>>, %arg6: memref<1x16x128xbf16, #tpu.memory_space<vmem>>, %arg7: memref<1x16x128xf32, #tpu.memory_space<vmem>>) attributes {dimension_semantics = [#tpu.dimension_semantics<parallel>, #tpu.dimension_semantics<parallel>], iteration_bounds = array<i64: 2, 1>, scalar_prefetch = 0 : i64, scratch_operands = 0 : i64, tpu.core_type = #tpu.core_type<tc>, window_params = [{pipeline_mode = #tpu.pipeline_mode<synchronous>, transform_indices = @transform_0, window_bounds = array<i64: 16, 256>}, {transform_indices = @transform_1, window_bounds = array<i64: 1, 256, 128>}, {pipeline_mode = #tpu.pipeline_mode<synchronous>, transform_indices = @transform_2, window_bounds = array<i64: 16, 1>}, {transform_indices = @transform_3, window_bounds = array<i64: 1>}, {transform_indices = @transform_4, window_bounds = array<i64: 1, 16, 128>}, {transform_indices = @transform_5, window_bounds = array<i64: 1, 16, 128>}]} {
    %c0 = arith.constant 0 : index
    %c0_0 = arith.constant 0 : index
    %0 = vector.load %arg2[%c0, %c0_0] : memref<16x256xbf16, #tpu.memory_space<vmem>>, vector<16x256xbf16>
    %c0_1 = arith.constant 0 : index
    %c0_2 = arith.constant 0 : index
    %c0_3 = arith.constant 0 : index
    %1 = vector.load %arg3[%c0_1, %c0_2, %c0_3] : memref<1x256x128xbf16, #tpu.memory_space<vmem>>, vector<1x256x128xbf16>
    %2 = vector.shape_cast %1 : vector<1x256x128xbf16> to vector<256x128xbf16>
    %cst = arith.constant dense<0.000000e+00> : vector<16x128xf32>
    %3 = tpu.matmul %0, %2, %cst {dimension_numbers = #tpu.dot_dimension_numbers<[1], [0], [0], [1], [0, 0, 1, 1], [], []>} : vector<16x256xbf16>, vector<256x128xbf16>, vector<16x128xf32> -> vector<16x128xf32>
    %c0_4 = arith.constant 0 : index
    %c0_5 = arith.constant 0 : index
    %4 = vector.load %arg4[%c0_4, %c0_5] : memref<16x1xf32, #tpu.memory_space<vmem>>, vector<16x1xf32>
    %5 = vector.broadcast %4 : vector<16x1xf32> to vector<16x128xf32>
    %6 = arith.addf %3, %5 : vector<16x128xf32>
    %c0_6 = arith.constant 0 : index
    %7 = memref.load %arg5[%c0_6] : memref<1xf32, #tpu.memory_space<smem>>
    %cst_7 = arith.constant 0.000000e+00 : f32
    %8 = vector.broadcast %cst_7 : f32 to vector<16x128xf32>
    %9 = arith.cmpf oge, %6, %8 : vector<16x128xf32>
    %10 = vector.broadcast %7 : f32 to vector<16x128xf32>
    %11 = arith.mulf %10, %6 : vector<16x128xf32>
    %12 = arith.select %9, %6, %11 : vector<16x128xi1>, vector<16x128xf32>
    %c0_8 = arith.constant 0 : index
    %c0_9 = arith.constant 0 : index
    %c0_10 = arith.constant 0 : index
    %13 = vector.load %arg6[%c0_8, %c0_9, %c0_10] : memref<1x16x128xbf16, #tpu.memory_space<vmem>>, vector<1x16x128xbf16>
    %14 = vector.shape_cast %13 : vector<1x16x128xbf16> to vector<16x128xbf16>
    %15 = arith.extf %14 : vector<16x128xbf16> to vector<16x128xf32>
    %16 = arith.addf %12, %15 : vector<16x128xf32>
    %c0_11 = arith.constant 0 : index
    %c0_12 = arith.constant 0 : index
    %c0_13 = arith.constant 0 : index
    %17 = vector.load %arg7[%c0_11, %c0_12, %c0_13] : memref<1x16x128xf32, #tpu.memory_space<vmem>>, vector<1x16x128xf32>
    %18 = vector.shape_cast %17 : vector<1x16x128xf32> to vector<16x128xf32>
    %19 = vector.shape_cast %16 : vector<16x128xf32> to vector<1x16x128xf32>
    tpu.vector_store %arg7[%c0_11, %c0_12, %c0_13], %19 {strides = array<i32>} : memref<1x16x128xf32, #tpu.memory_space<vmem>>, vector<1x16x128xf32>,
    return
  }
  func.func @transform_0(%arg0: i32, %arg1: i32) -> (i32, i32) {
    %c0_i32 = arith.constant 0 : i32
    %c0_i32_0 = arith.constant 0 : i32
    %c0_i32_1 = arith.constant 0 : i32
    return %c0_i32, %c0_i32_0 : i32, i32
  }
  func.func @transform_1(%arg0: i32, %arg1: i32) -> (i32, i32, i32) {
    %c0_i32 = arith.constant 0 : i32
    %c0_i32_0 = arith.constant 0 : i32
    return %arg0, %c0_i32, %arg1 : i32, i32, i32
  }
  func.func @transform_2(%arg0: i32, %arg1: i32) -> (i32, i32) {
    %c0_i32 = arith.constant 0 : i32
    %c0_i32_0 = arith.constant 0 : i32
    %c0_i32_1 = arith.constant 0 : i32
    return %c0_i32, %c0_i32_0 : i32, i32
  }
  func.func @transform_3(%arg0: i32, %arg1: i32) -> i32 {
    %c0_i32 = arith.constant 0 : i32
    %c0_i32_0 = arith.constant 0 : i32
    return %c0_i32 : i32
  }
  func.func @transform_4(%arg0: i32, %arg1: i32) -> (i32, i32, i32) {
    %c0_i32 = arith.constant 0 : i32
    %c0_i32_0 = arith.constant 0 : i32
    return %arg0, %c0_i32, %arg1 : i32, i32, i32
  }
  func.func @transform_5(%arg0: i32, %arg1: i32) -> (i32, i32, i32) {
    %c0_i32 = arith.constant 0 : i32
    %c0_i32_0 = arith.constant 0 : i32
    return %arg0, %c0_i32, %arg1 : i32, i32, i32
  }
}

</mosaic_0001>

<bundles_post_ra>
// kernel: down_block.3
= control target key start
LH: loop header
LB: loop body
LE: loop exit
PB: predicated region body
PF: predicated region fallthrough
CT: control target
= control target key end

     0   :  { %s685_s17 = smov 0   ;;  %s687_s18 = smov 0   ;;  %s752_s0 = inlined_call_operand.vmem [shape: bf16[16,256], index: 0, kind: input, shape index: {}]   ;;  %s753_s1 = inlined_call_operand.vmem [shape: bf16[2,256,128], index: 1, kind: input, shape index: {}]   ;;  %s754_s2 = inlined_call_operand.vmem [shape: f32[16,1], index: 2, kind: input, shape index: {}]   ;;  %s755_s3 = inlined_call_operand.<no memory space> [shape: f32[1], index: 3, kind: input, shape index: {}]   ;;  %s756_s4 = inlined_call_operand.vmem [shape: bf16[2,16,128], index: 4, kind: output, shape index: {}]  }
   0x1   :  { %9 = sst [smem:[#allocation2]] %s755_s3  ;;  %s689_s19 = smov 0  }
   0x2 LB: > { %s27_s3 = sadd.s32 1, %s650_s18  ;;  %p529_p0 = scmp.ge.s32.totalorder %s654_s19, 1  ;;  %s654_s19 = sphi %s689_s19, %s15_s19   ;;  %s650_s18 = sphi %s687_s18, %s758_s18   ;;  %s646_s17 = sphi %s685_s17, %s757_s17  }
   0x3   : > { %p29_p1 = scmp.ge.s32.totalorder %s27_s3, 2  ;;  %p182_p2 = scmp.lt.s32.totalorder %s654_s19, 3 }
   0x5   : > { %s760_s3 = smov (%p29_p1, %s27_s3), 0  ;;  %p183_p3 = pnand %p529_p0, %p182_p2 }
   0x6   : > { %p214_p4 = scmp.lt.s32.totalorder (!%p183_p3), %s646_s17, 1  ;;  %v631_v0 = vld [vmem:[%s752_s0 + $0x4] ss:$8 sps:$4 sm:$0xff] (!%p183_p3)   ;;  %v656_v1 = vmov (!%p183_p3), 0   ;;  %v629_v20 = vld [vmem:[%s752_s0] ss:$8 sps:$4 sm:$0xff] (!%p183_p3)  }
   0x7   : > { %186 = sbr.rel (%p183_p3) target bundleno = 275 (0x113), region = 36  ;;  %612 = vset.pattern.permute.xlu0 (!%p183_p3), %v656_v1  ;;  %v265_v2 = vld [vmem:[%s754_s2] sm:$0xff] (!%p183_p3)  ;;  %415 = vmatprep.mubr.bf16.mxu0 (!%p183_p3), %v631_v0  ;;  %v266_v3 = vld [vmem:[%s754_s2 + $0x8] sm:$0xff] (!%p183_p3)  ;;  %s424_s6 = sld [smem:[#allocation2]] (!%p183_p3) }
   0x8   : > { %269 = vperm.xlu0 (!%p183_p3), %612, %v265_v2  }
   0xc   : > { %274 = vperm.xlu0 (!%p183_p3), %612, %v266_v3  }
   0xd   : > { %v427_v26 = vstv (!%p183_p3), %s424_s6 }
   0xe   : > { %s762_s17 = smov (!%p214_p4, %s646_s17), 1 }
   0xf   : > { %s556_s26 = sshll.u32 %s762_s17, 7  ;;  %s557_s7 = sshll.u32 %s762_s17, 3 }
  0x10   : > { %s718_s29 = scalar_lea.vmem %s753_s1, %s556_s26  ;;  %s229_s10 = scalar_lea.vmem %s756_s4, %s557_s7 }
  0x11   : > { %v613_v4 = vld [vmem:[%s718_s29 + $0x40] sm:$0xff]   ;;  %v615_v6 = vld [vmem:[%s718_s29 + $0x48] sm:$0xff]   ;;  %v617_v8 = vld [vmem:[%s718_s29 + $0x50] sm:$0xff]  }
  0x12   : > { %v614_v5 = vld [vmem:[%s718_s29] sm:$0xff]   ;;  %565 = vmatprep.subr.bf16.mxu0 %v613_v4  ;;  %v616_v7 = vld [vmem:[%s718_s29 + $0x8] sm:$0xff]   ;;  %v618_v9 = vld [vmem:[%s718_s29 + $0x10] sm:$0xff]  }
  0x13   : > { %566 = vmatpush3.bf16.msra.mxu0 %v614_v5  ;;  %v619_v10 = vld [vmem:[%s718_s29 + $0x58] sm:$0xff]   ;;  %v621_v12 = vld [vmem:[%s718_s29 + $0x60] sm:$0xff]   ;;  %v623_v14 = vld [vmem:[%s718_s29 + $0x68] sm:$0xff]  }
  0x14   : > { %567 = vmatprep.subr.bf16.mxu0 %v615_v6  ;;  %v620_v11 = vld [vmem:[%s718_s29 + $0x18] sm:$0xff]   ;;  %v622_v13 = vld [vmem:[%s718_s29 + $0x20] sm:$0xff]   ;;  %v624_v15 = vld [vmem:[%s718_s29 + $0x28] sm:$0xff]  }
  0x15   : > { %v625_v16 = vld [vmem:[%s718_s29 + $0x70] sm:$0xff]   ;;  %v627_v18 = vld [vmem:[%s718_s29 + $0x78] sm:$0xff]  }
  0x16   : > { %v626_v17 = vld [vmem:[%s718_s29 + $0x30] sm:$0xff]   ;;  %v628_v19 = vld [vmem:[%s718_s29 + $0x38] sm:$0xff]  }
  0x17   : > { %568 = vmatpush3.bf16.msra.mxu0 %v616_v7 }
  0x18   : > { %569 = vmatprep.subr.bf16.mxu0 %v617_v8 }
  0x1b   : > { %570 = vmatpush3.bf16.msra.mxu0 %v618_v9 }
  0x1c   : > { %571 = vmatprep.subr.bf16.mxu0 %v619_v10 }
  0x1f   : > { %572 = vmatpush3.bf16.msra.mxu0 %v620_v11 }
  0x20   : > { %573 = vmatprep.subr.bf16.mxu0 %v621_v12 }
  0x23   : > { %574 = vmatpush3.bf16.msra.mxu0 %v622_v13 }
  0x24   : > { %575 = vmatprep.subr.bf16.mxu0 %v623_v14 }
  0x27   : > { %576 = vmatpush3.bf16.msra.mxu0 %v624_v15 }
  0x28   : > { %577 = vmatprep.subr.bf16.mxu0 %v625_v16 }
  0x2b   : > { %578 = vmatpush3.bf16.msra.mxu0 %v626_v17 }
  0x2c   : > { %579 = vmatprep.subr.bf16.mxu0 %v627_v18 }
  0x2f   : > { %580 = vmatpush3.bf16.msra.mxu0 %v628_v19 }
  0x32   : > { %416 = vmatmul.mubr.bf16.vlgmr.msra.gmra.mrb[0].mxu0 %v629_v20 }
  0x87   : > { %v270_v21 = vpop.permute.xlu0 %269 }
  0x8b   : > { %v275_v30 = vpop.permute.xlu0 %274 }
 0x105   : > { %v581_v22 = vpop.f32.mrb[0].mxu0 }
 0x106   : > { %v582_v23 = vpop.f32.mrb[1].mxu0 }
 0x107   : > { %v583_v24 = vadd.f32 %v582_v23, %v581_v22  ;;  %v584_v25 = vpop.f32.mrb[2].mxu0 }
 0x108   : > { %v585_v27 = vpop.f32.mrb[3].mxu0 }
 0x109   : > { %v418_v28 = vadd.f32 %v583_v24, %v270_v21  ;;  %v586_v29 = vadd.f32 %v585_v27, %v584_v25 }
 0x10b   : > { %v428_v31 = vmul.f32 %v427_v26, %v418_v28  ;;  %v421_v32 = vadd.f32 %v586_v29, %v275_v30  ;;  %vm425_vm0 = vcmp.ge.f32.partialorder %v418_v28, 0.0 }
 0x10d   : > { %vm426_vm1 = vcmp.ge.f32.partialorder %v421_v32, 0.0  ;;  %v429_v33 = vmul.f32 %v427_v26, %v421_v32  ;;  %v430_v34 = vsel %vm425_vm0, %v418_v28, %v428_v31 }
 0x10f   : > { %v431_v35 = vsel %vm426_vm1, %v421_v32, %v429_v33 }
 0x110   : > { %v563_v36 = vpack.c.bf16 %v431_v35, %v430_v34 }
 0x112   : > { %564 = vst [vmem:[%s229_s10] sm:$0xff] %v563_v36  }
 0x113 PF: > { %s15_s19 = sadd.s32 1, %s654_s19   ;;  %s757_s17 = smov %s650_s18 }
 0x114   : > { %p12_p5 = scmp.ge.s32.totalorder %s15_s19, 4   ;;  %s758_s18 = smov %s760_s3 }
 0x116   :  { %14 = sbr.rel (!%p12_p5) target bundleno = 2 (0x2), region = 66 }

// kernel: tile.0
= control target key start
LH: loop header
LB: loop body
LE: loop exit
PB: predicated region body
PF: predicated region fallthrough
CT: control target
= control target key end

     0   :  { %vm3_vm0 = vcmask 7168   ;;  %s64_s10 = smov 127   ;;  %s65_s15 = smov 125   ;;  %s114_s0 = inlined_call_operand.vmem [shape: f32[16,4], index: 0, kind: input, shape index: {}]   ;;  %s115_s1 = inlined_call_operand.vmem [shape: f32[64,1], index: 1, kind: output, shape index: {}]  }
   0x1   :  { %v23_v0 = vld [vmem:[%s114_s0] sm:$0xff]   ;;  %v49_v1 = vld [vmem:[%s114_s0 + $0x8] sm:$0xff]   ;;  %s63_s0 = smov 126  }
   0x2   :  { %24 = vrot.lane.b32.xlu1 %v23_v0, %s63_s0  ;;  %11 = vrot.lane.b32.xlu0 %v23_v0, %s64_s10  ;;  %4 = vst.msk [vmem:[%s115_s1] ss:$4 sm:$0xff] %vm3_vm0, %v23_v0   ;;  %50 = vst.msk [vmem:[%s115_s1 + $0x20] ss:$4 sm:$0xff] %vm3_vm0, %v49_v1  }
   0x6   :  { %31 = vrot.lane.b32.xlu1 %v49_v1, %s63_s0  ;;  %18 = vrot.lane.b32.xlu0 %v49_v1, %s64_s10 }
   0xa   :  { %44 = vrot.lane.b32.xlu1 %v49_v1, %s65_s15  ;;  %37 = vrot.lane.b32.xlu0 %v23_v0, %s65_s15 }
  0x74   :  { %v25_v2 = vpop.permute.xlu1 %24   ;;  %v12_v3 = vpop.permute.xlu0 %11  }
  0x75   :  { %54 = vst.msk [vmem:[%s115_s1 + $0x2] ss:$4 sm:$0xff] %vm3_vm0, %v25_v2   ;;  %51 = vst.msk [vmem:[%s115_s1 + $0x1] ss:$4 sm:$0xff] %vm3_vm0, %v12_v3  }
  0x78   :  { %v32_v4 = vpop.permute.xlu1 %31   ;;  %v19_v5 = vpop.permute.xlu0 %18  }
  0x79   :  { %56 = vst.msk [vmem:[%s115_s1 + $0x22] ss:$4 sm:$0xff] %vm3_vm0, %v32_v4   ;;  %53 = vst.msk [vmem:[%s115_s1 + $0x21] ss:$4 sm:$0xff] %vm3_vm0, %v19_v5  }
  0x7c   :  { %v45_v6 = vpop.permute.xlu1 %44   ;;  %v38_v7 = vpop.permute.xlu0 %37  }
  0x7d   :  { %59 = vst.msk [vmem:[%s115_s1 + $0x23] ss:$4 sm:$0xff] %vm3_vm0, %v45_v6   ;;  %57 = vst.msk [vmem:[%s115_s1 + $0x3] ss:$4 sm:$0xff] %vm3_vm0, %v38_v7  }

// kernel: tile.8
= control target key start
LH: loop header
LB: loop body
LE: loop exit
PB: predicated region body
PF: predicated region fallthrough
CT: control target
= control target key end

     0   :  { %s28_s0 = inlined_call_operand.vmem [shape: f32[4], index: 0, kind: input, shape index: {}]   ;;  %s29_s1 = inlined_call_operand.vmem [shape: f32[16,4], index: 1, kind: output, shape index: {}]  }
   0x1   :  { %v4_v0 = vld [vmem:[%s28_s0] ss:$0 sm:$0xff] }
   0x2   :  { %5 = vst [vmem:[%s29_s1] sm:$0xff] %v4_v0  ;;  %8 = vst [vmem:[%s29_s1 + $0x8] sm:$0xff] %v4_v0 }

// kernel: down_block.4
= control target key start
LH: loop header
LB: loop body
LE: loop exit
PB: predicated region body
PF: predicated region fallthrough
CT: control target
= control target key end

     0   :  { %s705_s17 = smov 0   ;;  %s707_s18 = smov 0   ;;  %s784_s0 = inlined_call_operand.vmem [shape: bf16[64,16], index: 0, kind: input, shape index: {}]   ;;  %s785_s1 = inlined_call_operand.vmem [shape: bf16[2,16,128], index: 1, kind: input, shape index: {}]   ;;  %s786_s2 = inlined_call_operand.vmem [shape: f32[64,1], index: 2, kind: input, shape index: {}]   ;;  %s787_s3 = inlined_call_operand.<no memory space> [shape: f32[1], index: 3, kind: input, shape index: {}]   ;;  %s788_s4 = inlined_call_operand.vmem [shape: bf16[2,64,128], index: 4, kind: output, shape index: {}]  }
   0x1   :  { %9 = sst [smem:[#allocation2]] %s787_s3  ;;  %s709_s19 = smov 0  }
   0x2 LB: > { %s27_s3 = sadd.s32 1, %s670_s18  ;;  %p546_p0 = scmp.ge.s32.totalorder %s674_s19, 1  ;;  %s674_s19 = sphi %s709_s19, %s15_s19   ;;  %s670_s18 = sphi %s707_s18, %s790_s18   ;;  %s666_s17 = sphi %s705_s17, %s789_s17  }
   0x3   : > { %p29_p1 = scmp.ge.s32.totalorder %s27_s3, 2  ;;  %p182_p2 = scmp.lt.s32.totalorder %s674_s19, 3 }
   0x5   : > { %s792_s3 = smov (%p29_p1, %s27_s3), 0  ;;  %p183_p3 = pnand %p546_p0, %p182_p2 }
   0x6   : > { %p214_p4 = scmp.lt.s32.totalorder (!%p183_p3), %s666_s17, 1  ;;  %v648_v0 = vld [vmem:[%s784_s0] sm:$0xff] (!%p183_p3)   ;;  %vm315_vm0 = vcmask (!%p183_p3), 130048   ;;  %v649_v1 = vld [vmem:[%s784_s0 + $0x10] sm:$0xff] (!%p183_p3)   ;;  %v676_v2 = vmov (!%p183_p3), 0   ;;  %v244_v6 = vld [vmem:[%s786_s2 + $0x18] sm:$0xff] (!%p183_p3) }
   0x7   : > { %186 = sbr.rel (%p183_p3) target bundleno = 247 (0xf7), region = 36  ;;  %610 = vmatprep.mubr.msk.bf16.mxu0 (!%p183_p3), %vm315_vm0, %v648_v0  ;;  %614 = vmatprep.mubr.msk.bf16.mxu1 (!%p183_p3), %vm315_vm0, %v649_v1  ;;  %v243_v3 = vld [vmem:[%s786_s2 + $0x10] sm:$0xff] (!%p183_p3)  ;;  %v241_v4 = vld [vmem:[%s786_s2] sm:$0xff] (!%p183_p3)  ;;  %v242_v7 = vld [vmem:[%s786_s2 + $0x8] sm:$0xff] (!%p183_p3)  ;;  %s393_s25 = sld [smem:[#allocation2]] (!%p183_p3) }
   0x8   : > { %646 = vset.pattern.permute.xlu1 (!%p183_p3), %v676_v2  ;;  %645 = vset.pattern.permute.xlu0 (!%p183_p3), %v676_v2  ;;  %v650_v8 = vld [vmem:[%s784_s0 + $0x8] sm:$0xff] (!%p183_p3)   ;;  %v651_v9 = vld [vmem:[%s784_s0 + $0x18] sm:$0xff] (!%p183_p3)   ;;  %v245_v11 = vld [vmem:[%s786_s2 + $0x20] sm:$0xff] (!%p183_p3) }
   0x9   : > { %261 = vperm.xlu1 (!%p183_p3), %646, %v243_v3   ;;  %251 = vperm.xlu0 (!%p183_p3), %645, %v241_v4   ;;  %v246_v10 = vld [vmem:[%s786_s2 + $0x28] sm:$0xff] (!%p183_p3)  ;;  %v248_v12 = vld [vmem:[%s786_s2 + $0x38] sm:$0xff] (!%p183_p3)  ;;  %v247_v13 = vld [vmem:[%s786_s2 + $0x30] sm:$0xff] (!%p183_p3) }
   0xd   : > { %266 = vperm.xlu1 (!%p183_p3), %646, %v244_v6   ;;  %256 = vperm.xlu0 (!%p183_p3), %645, %v242_v7   ;;  %v402_v22 = vstv (!%p183_p3), %s393_s25 }
   0xe   : > { %s794_s17 = smov (!%p214_p4, %s666_s17), 1 }
   0xf   : > { %s570_s24 = sshll.u32 %s794_s17, 3  ;;  %s571_s26 = sshll.u32 %s794_s17, 5 }
  0x10   : > { %s221_s5 = scalar_lea.vmem %s785_s1, %s570_s24  ;;  %s229_s29 = scalar_lea.vmem %s788_s4, %s571_s26 }
  0x11   : > { %v647_v5 = vld [vmem:[%s221_s5] sm:$0xff]   ;;  %276 = vperm.xlu1 %646, %v246_v10   ;;  %271 = vperm.xlu0 %645, %v245_v11  }
  0x12   : > { %608 = vmatprep.subr.bf16.mxu0 %v647_v5  ;;  %618 = vmatprep.subr.bf16.mxu1 %v647_v5 }
  0x13   : > { %609 = vmatpush3.bf16.msra.mxu0 %v647_v5  ;;  %619 = vmatpush3.bf16.msra.mxu1 %v647_v5 }
  0x15   : > { %286 = vperm.xlu1 %646, %v248_v12   ;;  %281 = vperm.xlu0 %645, %v247_v13  }
  0x16   : > { %611 = vmatmul.mubr.msk.bf16.vlgmr.msra.gmra.mrb[0].mxu0 %vm315_vm0, %v650_v8  ;;  %615 = vmatmul.mubr.msk.bf16.vlgmr.msra.gmra.mrb[0].mxu1 %vm315_vm0, %v651_v9 }
  0x88   : > { %v252_v14 = vpop.permute.xlu0 %251  ;;  %v262_v15 = vpop.permute.xlu1 %261 }
  0x8c   : > { %v257_v16 = vpop.permute.xlu0 %256  ;;  %v267_v17 = vpop.permute.xlu1 %266 }
  0x90   : > { %v272_v18 = vpop.permute.xlu0 %271  ;;  %v277_v19 = vpop.permute.xlu1 %276 }
  0x94   : > { %v282_v20 = vpop.permute.xlu0 %281  ;;  %v287_v36 = vpop.permute.xlu1 %286 }
  0xe9   : > { %v612_v21 = vpop.f32.mrb[0].mxu0  ;;  %v616_v23 = vpop.f32.mrb[0].mxu1 }
  0xea   : > { %v371_v24 = vadd.f32 %v612_v21, %v262_v15  ;;  %v387_v25 = vadd.f32 %v616_v23, %v282_v20  ;;  %v362_v26 = vpop.f32.mrb[1].mxu0  ;;  %v378_v27 = vpop.f32.mrb[1].mxu1 }
  0xeb   : > { %v363_v28 = vadd.f32 %v362_v26, %v252_v14  ;;  %v379_v29 = vadd.f32 %v378_v27, %v272_v18  ;;  %v613_v30 = vpop.f32.mrb[2].mxu0  ;;  %v617_v31 = vpop.f32.mrb[2].mxu1 }
  0xec   : > { %vm396_vm1 = vcmp.ge.f32.partialorder %v371_v24, 0.0  ;;  %v405_v32 = vmul.f32 %v402_v22, %v371_v24  ;;  %vm400_vm2 = vcmp.ge.f32.partialorder %v387_v25, 0.0  ;;  %v409_v33 = vmul.f32 %v402_v22, %v387_v25  ;;  %v365_v34 = vpop.f32.mrb[3].mxu0  ;;  %v381_v35 = vpop.f32.mrb[3].mxu1 }
  0xed   : > { %vm394_vm3 = vcmp.ge.f32.partialorder %v363_v28, 0.0  ;;  %v403_v37 = vmul.f32 %v402_v22, %v363_v28  ;;  %vm398_vm4 = vcmp.ge.f32.partialorder %v379_v29, 0.0  ;;  %v407_v38 = vmul.f32 %v402_v22, %v379_v29 }
  0xee   : > { %v374_v39 = vadd.f32 %v613_v30, %v267_v17  ;;  %v390_v40 = vadd.f32 %v617_v31, %v287_v36  ;;  %v413_v41 = vsel %vm396_vm1, %v371_v24, %v405_v32  ;;  %v417_v42 = vsel %vm400_vm2, %v387_v25, %v409_v33 }
  0xef   : > { %v366_v43 = vadd.f32 %v365_v34, %v257_v16  ;;  %v382_v44 = vadd.f32 %v381_v35, %v277_v19  ;;  %v411_v49 = vsel %vm394_vm3, %v363_v28, %v403_v37  ;;  %v415_v50 = vsel %vm398_vm4, %v379_v29, %v407_v38 }
  0xf0   : > { %vm397_vm5 = vcmp.ge.f32.partialorder %v374_v39, 0.0  ;;  %v406_v45 = vmul.f32 %v402_v22, %v374_v39  ;;  %vm401_vm6 = vcmp.ge.f32.partialorder %v390_v40, 0.0  ;;  %v410_v46 = vmul.f32 %v402_v22, %v390_v40 }
  0xf1   : > { %vm395_vm7 = vcmp.ge.f32.partialorder %v366_v43, 0.0  ;;  %v404_v47 = vmul.f32 %v402_v22, %v366_v43  ;;  %vm399_vm8 = vcmp.ge.f32.partialorder %v382_v44, 0.0  ;;  %v408_v48 = vmul.f32 %v402_v22, %v382_v44 }
  0xf2   : > { %v414_v51 = vsel %vm397_vm5, %v374_v39, %v406_v45  ;;  %v418_v52 = vsel %vm401_vm6, %v390_v40, %v410_v46 }
  0xf3   : > { %v588_v53 = vpack.c.bf16 %v414_v51, %v413_v41  ;;  %v598_v54 = vpack.c.bf16 %v418_v52, %v417_v42  ;;  %v412_v55 = vsel %vm395_vm7, %v366_v43, %v404_v47  ;;  %v416_v56 = vsel %vm399_vm8, %v382_v44, %v408_v48 }
  0xf4   : > { %v583_v57 = vpack.c.bf16 %v412_v55, %v411_v49  ;;  %v593_v58 = vpack.c.bf16 %v416_v56, %v415_v50 }
  0xf5   : > { %600 = vst [vmem:[%s229_s29 + $0x8] sm:$0xff] %v588_v53   ;;  %602 = vst [vmem:[%s229_s29 + $0x18] sm:$0xff] %v598_v54  }
  0xf6   : > { %584 = vst [vmem:[%s229_s29] sm:$0xff] %v583_v57   ;;  %601 = vst [vmem:[%s229_s29 + $0x10] sm:$0xff] %v593_v58  }
  0xf7 PF: > { %s15_s19 = sadd.s32 1, %s674_s19   ;;  %s789_s17 = smov %s670_s18 }
  0xf8   : > { %p12_p5 = scmp.ge.s32.totalorder %s15_s19, 4   ;;  %s790_s18 = smov %s792_s3 }
  0xfa   :  { %14 = sbr.rel (!%p12_p5) target bundleno = 2 (0x2), region = 66 }

// kernel: down_block.5
= control target key start
LH: loop header
LB: loop body
LE: loop exit
PB: predicated region body
PF: predicated region fallthrough
CT: control target
= control target key end

     0   :  { %s762_s20 = smov 0   ;;  %s764_s21 = smov 0   ;;  %s833_s0 = inlined_call_operand.vmem [shape: bf16[16,256], index: 0, kind: input, shape index: {}]   ;;  %s834_s1 = inlined_call_operand.vmem [shape: bf16[2,256,128], index: 1, kind: input, shape index: {}]   ;;  %s835_s2 = inlined_call_operand.vmem [shape: f32[16,1], index: 2, kind: input, shape index: {}]   ;;  %s836_s3 = inlined_call_operand.<no memory space> [shape: f32[1], index: 3, kind: input, shape index: {}]   ;;  %s837_s4 = inlined_call_operand.vmem [shape: bf16[2,16,128], index: 4, kind: input, shape index: {}]   ;;  %s838_s5 = inlined_call_operand.vmem [shape: f32[2,16,128], index: 5, kind: output, shape index: {}]  }
   0x1   :  { %10 = sst [smem:[#allocation2]] %s836_s3  ;;  %s766_s22 = smov 0  }
   0x2 LB: > { %s28_s3 = sadd.s32 1, %s722_s21  ;;  %p603_p0 = scmp.ge.s32.totalorder %s726_s22, 1  ;;  %s726_s22 = sphi %s766_s22, %s16_s22   ;;  %s722_s21 = sphi %s764_s21, %s840_s21   ;;  %s718_s20 = sphi %s762_s20, %s839_s20  }
   0x3   : > { %p30_p1 = scmp.ge.s32.totalorder %s28_s3, 2  ;;  %p222_p2 = scmp.lt.s32.totalorder %s726_s22, 3 }
   0x5   : > { %s842_s3 = smov (%p30_p1, %s28_s3), 0  ;;  %p223_p3 = pnand %p603_p0, %p222_p2 }
   0x6   : > { %p264_p4 = scmp.lt.s32.totalorder (!%p223_p3), %s718_s20, 1  ;;  %v703_v0 = vld [vmem:[%s833_s0 + $0x4] ss:$8 sps:$4 sm:$0xff] (!%p223_p3)   ;;  %v728_v1 = vmov (!%p223_p3), 0   ;;  %v701_v20 = vld [vmem:[%s833_s0] ss:$8 sps:$4 sm:$0xff] (!%p223_p3)  }
   0x7   : > { %226 = sbr.rel (%p223_p3) target bundleno = 275 (0x113), region = 40  ;;  %684 = vset.pattern.permute.xlu0 (!%p223_p3), %v728_v1  ;;  %v323_v2 = vld [vmem:[%s835_s2] sm:$0xff] (!%p223_p3)  ;;  %473 = vmatprep.mubr.bf16.mxu0 (!%p223_p3), %v703_v0  ;;  %v324_v3 = vld [vmem:[%s835_s2 + $0x8] sm:$0xff] (!%p223_p3)  ;;  %s482_s10 = sld [smem:[#allocation2]] (!%p223_p3) }
   0x8   : > { %327 = vperm.xlu0 (!%p223_p3), %684, %v323_v2  }
   0xc   : > { %332 = vperm.xlu0 (!%p223_p3), %684, %v324_v3  }
   0xd   : > { %v485_v27 = vstv (!%p223_p3), %s482_s10 }
   0xe   : > { %s844_s20 = smov (!%p264_p4, %s718_s20), 1 }
   0xf   : > { %s630_s29 = sshll.u32 %s844_s20, 7  ;;  %s631_s11 = sshll.u32 %s844_s20, 3 }
  0x10   : > { %s795_s7 = scalar_lea.vmem %s834_s1, %s630_s29  ;;  %s279_s14 = scalar_lea.vmem %s837_s4, %s631_s11 }
  0x11   : > { %v685_v4 = vld [vmem:[%s795_s7 + $0x40] sm:$0xff]   ;;  %v687_v6 = vld [vmem:[%s795_s7 + $0x48] sm:$0xff]   ;;  %v689_v8 = vld [vmem:[%s795_s7 + $0x50] sm:$0xff]   ;;  %s632_s15 = sshll.u32 %s844_s20, 4 }
  0x12   : > { %v686_v5 = vld [vmem:[%s795_s7] sm:$0xff]   ;;  %637 = vmatprep.subr.bf16.mxu0 %v685_v4  ;;  %v688_v7 = vld [vmem:[%s795_s7 + $0x8] sm:$0xff]   ;;  %v690_v9 = vld [vmem:[%s795_s7 + $0x10] sm:$0xff]   ;;  %s287_s18 = scalar_lea.vmem %s838_s5, %s632_s15 }
  0x13   : > { %638 = vmatpush3.bf16.msra.mxu0 %v686_v5  ;;  %v691_v10 = vld [vmem:[%s795_s7 + $0x58] sm:$0xff]   ;;  %v693_v12 = vld [vmem:[%s795_s7 + $0x60] sm:$0xff]   ;;  %v695_v14 = vld [vmem:[%s795_s7 + $0x68] sm:$0xff]  }
  0x14   : > { %639 = vmatprep.subr.bf16.mxu0 %v687_v6  ;;  %v692_v11 = vld [vmem:[%s795_s7 + $0x18] sm:$0xff]   ;;  %v694_v13 = vld [vmem:[%s795_s7 + $0x20] sm:$0xff]   ;;  %v696_v15 = vld [vmem:[%s795_s7 + $0x28] sm:$0xff]  }
  0x15   : > { %v697_v16 = vld [vmem:[%s795_s7 + $0x70] sm:$0xff]   ;;  %v699_v18 = vld [vmem:[%s795_s7 + $0x78] sm:$0xff]   ;;  %v634_v25 = vld [vmem:[%s279_s14] sm:$0xff]  }
  0x16   : > { %v698_v17 = vld [vmem:[%s795_s7 + $0x30] sm:$0xff]   ;;  %v700_v19 = vld [vmem:[%s795_s7 + $0x38] sm:$0xff]   ;;  %v635_v32 = vunpack.c.l.bf16 %v634_v25  ;;  %v636_v35 = vunpack.c.h.bf16 %v634_v25 }
  0x17   : > { %640 = vmatpush3.bf16.msra.mxu0 %v688_v7 }
  0x18   : > { %641 = vmatprep.subr.bf16.mxu0 %v689_v8 }
  0x1b   : > { %642 = vmatpush3.bf16.msra.mxu0 %v690_v9 }
  0x1c   : > { %643 = vmatprep.subr.bf16.mxu0 %v691_v10 }
  0x1f   : > { %644 = vmatpush3.bf16.msra.mxu0 %v692_v11 }
  0x20   : > { %645 = vmatprep.subr.bf16.mxu0 %v693_v12 }
  0x23   : > { %646 = vmatpush3.bf16.msra.mxu0 %v694_v13 }
  0x24   : > { %647 = vmatprep.subr.bf16.mxu0 %v695_v14 }
  0x27   : > { %648 = vmatpush3.bf16.msra.mxu0 %v696_v15 }
  0x28   : > { %649 = vmatprep.subr.bf16.mxu0 %v697_v16 }
  0x2b   : > { %650 = vmatpush3.bf16.msra.mxu0 %v698_v17 }
  0x2c   : > { %651 = vmatprep.subr.bf16.mxu0 %v699_v18 }
  0x2f   : > { %652 = vmatpush3.bf16.msra.mxu0 %v700_v19 }
  0x32   : > { %474 = vmatmul.mubr.bf16.vlgmr.msra.gmra.mrb[0].mxu0 %v701_v20 }
  0x87   : > { %v328_v21 = vpop.permute.xlu0 %327 }
  0x8b   : > { %v333_v31 = vpop.permute.xlu0 %332 }
 0x105   : > { %v653_v22 = vpop.f32.mrb[0].mxu0 }
 0x106   : > { %v654_v23 = vpop.f32.mrb[1].mxu0 }
 0x107   : > { %v655_v24 = vadd.f32 %v654_v23, %v653_v22  ;;  %v656_v26 = vpop.f32.mrb[2].mxu0 }
 0x108   : > { %v657_v28 = vpop.f32.mrb[3].mxu0 }
 0x109   : > { %v476_v29 = vadd.f32 %v655_v24, %v328_v21  ;;  %v658_v30 = vadd.f32 %v657_v28, %v656_v26 }
 0x10b   : > { %vm483_vm0 = vcmp.ge.f32.partialorder %v476_v29, 0.0  ;;  %v486_v33 = vmul.f32 %v485_v27, %v476_v29  ;;  %v479_v34 = vadd.f32 %v658_v30, %v333_v31 }
 0x10d   : > { %v488_v36 = vsel %vm483_vm0, %v476_v29, %v486_v33  ;;  %vm484_vm1 = vcmp.ge.f32.partialorder %v479_v34, 0.0  ;;  %v487_v37 = vmul.f32 %v485_v27, %v479_v34 }
 0x10e   : > { %v494_v38 = vadd.f32 %v635_v32, %v488_v36 }
 0x10f   : > { %v489_v39 = vsel %vm484_vm1, %v479_v34, %v487_v37 }
 0x110   : > { %496 = vst [vmem:[%s287_s18] sm:$0xff] %v494_v38  ;;  %v495_v40 = vadd.f32 %v636_v35, %v489_v39 }
 0x112   : > { %497 = vst [vmem:[%s287_s18 + $0x8] sm:$0xff] %v495_v40 }
 0x113 PF: > { %s16_s22 = sadd.s32 1, %s726_s22   ;;  %s839_s20 = smov %s722_s21 }
 0x114   : > { %p13_p5 = scmp.ge.s32.totalorder %s16_s22, 4   ;;  %s840_s21 = smov %s842_s3 }
 0x116   :  { %15 = sbr.rel (!%p13_p5) target bundleno = 2 (0x2), region = 73 }

</bundles_post_ra>
